<compile_context>
chip_gen: v6e
topology: v6e:2x2x1
jax: 0.10.0
libtpu: 0.0.40
codegen_flags: <defaults>
</compile_context>

<pallas_src>
import functools

import jax
import jax.numpy as jnp
from jax.experimental import pallas as pl
from jax.experimental.pallas import tpu as pltpu


# ---------------------------------------------------------------------------
# Synthetic bio_skin_model configuration
# ---------------------------------------------------------------------------
NUM_PROPS = 4       # latent_size: melanin, haemoglobin, thickness, oxygenation
HIDDEN = 32         # decoder hidden width
N_VIS = 32          # visible spectral bands
N_IR = 16           # infrared spectral bands
N_SPEC = N_VIS + N_IR          # 48
N_AUX = 4                      # rgb(3) + ir_avg(1)
SLAB = N_SPEC + N_AUX          # 52-sublane fused output slab (no pad lanes)

DEFAULT_TILE_N = 8192          # pixels per grid step (channel-major tiles cost
                               # ~1 KiB/row incl. double-buffering -> ~8 MiB,
                               # fine even under v7x's 64 MiB per-TC VMEM)
_TILE_CANDIDATES = (8192, 4096, 2048, 1024, 512, 256)


def _decoder_kernel(x_ref, w1_ref, b1_ref, w2_ref, b2_ref, w3_ref, b3_ref,
                    proj_ref, slab_ref):
    """Per-tile skin_props -> fused reflectance slab, channel-major.

    x_ref:    (NUM_PROPS, TN)      pixels on lanes
    w1/b1:    (HIDDEN, NUM_PROPS), (HIDDEN, 1)
    w2/b2:    (HIDDEN, HIDDEN),    (HIDDEN, 1)
    w3/b3:    (N_SPEC, HIDDEN),    (N_SPEC, 1)
    proj:     (N_AUX, N_SPEC)      [cmat^T ; ir-mean weights] folded matmul (f32)
    slab_ref: (SLAB, TN)           [vis(32) | ir(16) | rgb(3) | ir_avg(1)]
    """
    x = x_ref[...]

    h1 = jnp.maximum(
        jnp.dot(w1_ref[...], x, preferred_element_type=jnp.float32) + b1_ref[...],
        0.0)
    h2 = jnp.maximum(
        jnp.dot(w2_ref[...], h1, preferred_element_type=jnp.float32) + b2_ref[...],
        0.0)
    z = jnp.dot(w3_ref[...], h2, preferred_element_type=jnp.float32) + b3_ref[...]

    # sigmoid(z) == 0.5 * tanh(0.5 * z) + 0.5 : one EUP push per vreg.
    spec = 0.5 * jnp.tanh(0.5 * z) + 0.5

    # rgb + ir_avg in one tiny matmul (kept in f32 so vis/ir bands stay exact).
    aux = jnp.dot(proj_ref[...], spec, preferred_element_type=jnp.float32)

    # Two aligned sub-ref stores -- no concatenate, no extra (SLAB, TN) temp.
    slab_ref[pl.ds(0, N_SPEC), :] = spec.astype(slab_ref.dtype)
    slab_ref[pl.ds(N_SPEC, N_AUX), :] = aux.astype(slab_ref.dtype)


def _round_up(x, m):
    return (x + m - 1) // m * m


def _pick_tile(n, tile_cap):
    """Largest candidate tile with <= ~6% pad waste; prefer grid >= 2 (v7x megacore)."""
    cands = [t for t in _TILE_CANDIDATES if t <= tile_cap] or [256]
    tile = cands[-1]
    for t in cands:
        if (_round_up(n, t) - n) * 16 <= n:    # pad waste <= 6.25%
            tile = t
            break
    while tile > 256 and _round_up(n, tile) // tile < 2:
        tile //= 2
    return tile


@functools.partial(jax.jit, static_argnames=("tile_n", "out_dtype"))
def skin_props_to_reflectance(skin_props, params,
                              tile_n=DEFAULT_TILE_N, out_dtype=jnp.float32):
    """Pallas-accelerated bio_skin_model.skin_props_to_reflectance."""
    n, p = skin_props.shape
    assert p == NUM_PROPS
    w1, b1, w2, b2, w3, b3, cmat = params

    # Channel-major weights for the (C_out, C_in) @ (C_in, N) hot path.
    w1t, b1t = w1.T, b1.T                 # (HIDDEN, P), (HIDDEN, 1)
    w2t, b2t = w2.T, b2.T                 # (HIDDEN, HIDDEN), (HIDDEN, 1)
    w3t, b3t = w3.T, b3.T                 # (N_SPEC, HIDDEN), (N_SPEC, 1)

    # Fold spectrum->RGB projection and the IR mean into one (N_AUX, N_SPEC) matrix:
    #   aux[0:3, :] = cmat^T @ vis      (rgb)
    #   aux[3,   :] = mean(ir)          (ir_avg)
    proj_t = jnp.zeros((N_AUX, N_SPEC), jnp.float32)
    proj_t = proj_t.at[0:3, :N_VIS].set(cmat.T)
    proj_t = proj_t.at[3, N_VIS:].set(1.0 / N_IR)

    # Tile sizing: big lane-dense tiles, bounded pad waste, grid >= 2 when possible.
    tile = _pick_tile(n, tile_n)
    n_pad = _round_up(n, tile)

    # Pixels on lanes: transpose to (NUM_PROPS, N) and pad the pixel axis.
    x_t = skin_props.T
    if n_pad != n:
        x_t = jnp.pad(x_t, ((0, 0), (0, n_pad - n)))

    grid = (n_pad // tile,)

    full = lambda *shape: pl.BlockSpec(shape, lambda i: tuple(0 for _ in shape))
    col = lambda r: pl.BlockSpec((r, tile), lambda i: (0, i))

    slab = pl.pallas_call(
        _decoder_kernel,
        out_shape=jax.ShapeDtypeStruct((SLAB, n_pad), out_dtype),
        grid_spec=pltpu.PrefetchScalarGridSpec(
            num_scalar_prefetch=0,
            grid=grid,
            in_specs=[
                col(NUM_PROPS),                 # skin_props tile (P, TN)
                full(HIDDEN, NUM_PROPS),        # w1^T
                full(HIDDEN, 1),                # b1^T
                full(HIDDEN, HIDDEN),           # w2^T
                full(HIDDEN, 1),                # b2^T
                full(N_SPEC, HIDDEN),           # w3^T
                full(N_SPEC, 1),                # b3^T
                full(N_AUX, N_SPEC),            # fused rgb/ir_avg projection (f32)
            ],
            out_specs=col(SLAB),                # single fused output slab (SLAB, TN)
        ),
        compiler_params=pltpu.CompilerParams(
            dimension_semantics=("parallel",),
            vmem_limit_bytes=40 * 1024 * 1024),
    )(x_t, w1t, b1t, w2t, b2t, w3t, b3t, proj_t)

    # Back to pixel-major views expected by BioProps (small XLA transposes).
    slab = slab[:, :n].astype(jnp.float32)
    ref_vis = slab[:N_VIS].T                          # (N, 32)
    ref_ir = slab[N_VIS:N_SPEC].T                     # (N, 16)
    ref_vis_rgb = slab[N_SPEC:N_SPEC + 3].T           # (N, 3)
    ref_ir_avg = slab[N_SPEC + 3:N_SPEC + 4].T        # (N, 1)
    return ref_vis, ref_vis_rgb, ref_ir, ref_ir_avg


def bioprops_forward(skin_props, params, tensor_size):
    """Equivalent of BioProps.forward(): returns (reflectance_map, skin_property_maps)."""
    h, w = tensor_size
    ref_vis, ref_vis_rgb, ref_ir, ref_ir_avg = skin_props_to_reflectance(
        skin_props, params)
    reflectance_map = ref_vis_rgb.reshape(h, w, 3)
    skin_property_maps = skin_props.reshape(h, w, NUM_PROPS)
    return reflectance_map, skin_property_maps, (ref_vis, ref_ir, ref_ir_avg)


def make_params(key):
    ks = jax.random.split(key, 4)
    w1 = jax.random.normal(ks[0], (NUM_PROPS, HIDDEN), jnp.float32) * 0.3
    b1 = jnp.zeros((1, HIDDEN), jnp.float32)
    w2 = jax.random.normal(ks[1], (HIDDEN, HIDDEN), jnp.float32) * 0.2
    b2 = jnp.zeros((1, HIDDEN), jnp.float32)
    w3 = jax.random.normal(ks[2], (HIDDEN, N_SPEC), jnp.float32) * 0.2
    b3 = jnp.zeros((1, N_SPEC), jnp.float32)
    # deterministic synthetic color-matching-like weights (rows sum softly to RGB)
    cmat = jax.nn.softmax(
        jax.random.normal(ks[3], (N_VIS, 3), jnp.float32), axis=0)
    return (w1, b1, w2, b2, w3, b3, cmat)


def reference_forward(skin_props, params):
    """Pure-JAX reference for correctness checking."""
    w1, b1, w2, b2, w3, b3, cmat = params
    h1 = jnp.maximum(skin_props @ w1 + b1, 0.0)
    h2 = jnp.maximum(h1 @ w2 + b2, 0.0)
    spec = jax.nn.sigmoid(h2 @ w3 + b3)
    vis, ir = spec[:, :N_VIS], spec[:, N_VIS:]
    return vis, vis @ cmat, ir, jnp.mean(ir, axis=-1, keepdims=True)


if __name__ == "__main__":
    key = jax.random.PRNGKey(0)
    kp, kx = jax.random.split(key)

    tensor_size = (16, 16)          # H, W  -> N = 256 pixels
    H, W = tensor_size
    N = H * W

    params = make_params(kp)

    # BioProps.__init__ : repeat initial_values over all pixels (plus tiny jitter
    # so the per-pixel MLP actually sees varying inputs).
    initial_values = jnp.array([0.5, 0.3, 0.7, 0.2], dtype=jnp.float32)[:NUM_PROPS]
    skin_props = jnp.tile(initial_values[None, :], (N, 1))
    skin_props = skin_props + 0.01 * jax.random.normal(kx, (N, NUM_PROPS), jnp.float32)

    reflectance_map, skin_property_maps, extras = bioprops_forward(
        skin_props, params, tensor_size)
    jax.block_until_ready((reflectance_map, skin_property_maps, extras))

    # correctness check against pure-JAX reference
    # TODO(synk): on v6e/v7x, pass out_dtype=jnp.bfloat16 for cheaper writeback and
    # loosen these tolerances accordingly (kept f32/exact here, v5e-friendly).
    ref_vis, ref_rgb, ref_ir, ref_ir_avg = reference_forward(skin_props, params)
    assert reflectance_map.shape == (H, W, 3)
    assert skin_property_maps.shape == (H, W, NUM_PROPS)
    assert jnp.allclose(reflectance_map, ref_rgb.reshape(H, W, 3), atol=1e-4)
    assert jnp.allclose(extras[0], ref_vis, atol=1e-4)
    assert jnp.allclose(extras[1], ref_ir, atol=1e-4)
    assert jnp.allclose(extras[2], ref_ir_avg, atol=1e-4)

    print("KERNEL_OK")
</pallas_src>

<mosaic_0001>
module attributes {stable_mosaic.version = 11 : i64} {
  func.func @_decoder_kernel(%arg0: i32, %arg1: memref<4x256xf32, #tpu.memory_space<vmem>>, %arg2: memref<32x4xf32, #tpu.memory_space<vmem>>, %arg3: memref<32x1xf32, #tpu.memory_space<vmem>>, %arg4: memref<32x32xf32, #tpu.memory_space<vmem>>, %arg5: memref<32x1xf32, #tpu.memory_space<vmem>>, %arg6: memref<48x32xf32, #tpu.memory_space<vmem>>, %arg7: memref<48x1xf32, #tpu.memory_space<vmem>>, %arg8: memref<4x48xf32, #tpu.memory_space<vmem>>, %arg9: memref<52x256xf32, #tpu.memory_space<vmem>>) attributes {dimension_semantics = [#tpu.dimension_semantics<parallel>], iteration_bounds = array<i64: 1>, scalar_prefetch = 0 : i64, scratch_operands = 0 : i64, tpu.core_type = #tpu.core_type<tc>, window_params = [{transform_indices = @transform_0, window_bounds = array<i64: 4, 256>}, {pipeline_mode = #tpu.pipeline_mode<synchronous>, transform_indices = @transform_1, window_bounds = array<i64: 32, 4>}, {pipeline_mode = #tpu.pipeline_mode<synchronous>, transform_indices = @transform_2, window_bounds = array<i64: 32, 1>}, {pipeline_mode = #tpu.pipeline_mode<synchronous>, transform_indices = @transform_3, window_bounds = array<i64: 32, 32>}, {pipeline_mode = #tpu.pipeline_mode<synchronous>, transform_indices = @transform_4, window_bounds = array<i64: 32, 1>}, {pipeline_mode = #tpu.pipeline_mode<synchronous>, transform_indices = @transform_5, window_bounds = array<i64: 48, 32>}, {pipeline_mode = #tpu.pipeline_mode<synchronous>, transform_indices = @transform_6, window_bounds = array<i64: 48, 1>}, {pipeline_mode = #tpu.pipeline_mode<synchronous>, transform_indices = @transform_7, window_bounds = array<i64: 4, 48>}, {transform_indices = @transform_8, window_bounds = array<i64: 52, 256>}]} {
    %c0 = arith.constant 0 : index
    %c0_0 = arith.constant 0 : index
    %0 = vector.load %arg1[%c0, %c0_0] : memref<4x256xf32, #tpu.memory_space<vmem>>, vector<4x256xf32>
    %c0_1 = arith.constant 0 : index
    %c0_2 = arith.constant 0 : index
    %1 = vector.load %arg2[%c0_1, %c0_2] : memref<32x4xf32, #tpu.memory_space<vmem>>, vector<32x4xf32>
    %cst = arith.constant dense<0.000000e+00> : vector<32x256xf32>
    %2 = tpu.matmul %1, %0, %cst {dimension_numbers = #tpu.dot_dimension_numbers<[1], [0], [0], [1], [0, 0, 1, 1], [], []>} : vector<32x4xf32>, vector<4x256xf32>, vector<32x256xf32> -> vector<32x256xf32>
    %c0_3 = arith.constant 0 : index
    %c0_4 = arith.constant 0 : index
    %3 = vector.load %arg3[%c0_3, %c0_4] : memref<32x1xf32, #tpu.memory_space<vmem>>, vector<32x1xf32>
    %4 = vector.broadcast %3 : vector<32x1xf32> to vector<32x256xf32>
    %5 = arith.addf %2, %4 : vector<32x256xf32>
    %cst_5 = arith.constant 0.000000e+00 : f32
    %6 = vector.broadcast %cst_5 : f32 to vector<32x256xf32>
    %7 = arith.maximumf %5, %6 : vector<32x256xf32>
    %c0_6 = arith.constant 0 : index
    %c0_7 = arith.constant 0 : index
    %8 = vector.load %arg4[%c0_6, %c0_7] : memref<32x32xf32, #tpu.memory_space<vmem>>, vector<32x32xf32>
    %cst_8 = arith.constant dense<0.000000e+00> : vector<32x256xf32>
    %9 = tpu.matmul %8, %7, %cst_8 {dimension_numbers = #tpu.dot_dimension_numbers<[1], [0], [0], [1], [0, 0, 1, 1], [], []>} : vector<32x32xf32>, vector<32x256xf32>, vector<32x256xf32> -> vector<32x256xf32>
    %c0_9 = arith.constant 0 : index
    %c0_10 = arith.constant 0 : index
    %10 = vector.load %arg5[%c0_9, %c0_10] : memref<32x1xf32, #tpu.memory_space<vmem>>, vector<32x1xf32>
    %11 = vector.broadcast %10 : vector<32x1xf32> to vector<32x256xf32>
    %12 = arith.addf %9, %11 : vector<32x256xf32>
    %cst_11 = arith.constant 0.000000e+00 : f32
    %13 = vector.broadcast %cst_11 : f32 to vector<32x256xf32>
    %14 = arith.maximumf %12, %13 : vector<32x256xf32>
    %c0_12 = arith.constant 0 : index
    %c0_13 = arith.constant 0 : index
    %15 = vector.load %arg6[%c0_12, %c0_13] : memref<48x32xf32, #tpu.memory_space<vmem>>, vector<48x32xf32>
    %cst_14 = arith.constant dense<0.000000e+00> : vector<48x256xf32>
    %16 = tpu.matmul %15, %14, %cst_14 {dimension_numbers = #tpu.dot_dimension_numbers<[1], [0], [0], [1], [0, 0, 1, 1], [], []>} : vector<48x32xf32>, vector<32x256xf32>, vector<48x256xf32> -> vector<48x256xf32>
    %c0_15 = arith.constant 0 : index
    %c0_16 = arith.constant 0 : index
    %17 = vector.load %arg7[%c0_15, %c0_16] : memref<48x1xf32, #tpu.memory_space<vmem>>, vector<48x1xf32>
    %18 = vector.broadcast %17 : vector<48x1xf32> to vector<48x256xf32>
    %19 = arith.addf %16, %18 : vector<48x256xf32>
    %cst_17 = arith.constant 5.000000e-01 : f32
    %20 = vector.broadcast %cst_17 : f32 to vector<48x256xf32>
    %21 = arith.mulf %20, %19 : vector<48x256xf32>
    %22 = math.tanh %21 : vector<48x256xf32>
    %cst_18 = arith.constant 5.000000e-01 : f32
    %23 = vector.broadcast %cst_18 : f32 to vector<48x256xf32>
    %24 = arith.mulf %23, %22 : vector<48x256xf32>
    %cst_19 = arith.constant 5.000000e-01 : f32
    %25 = vector.broadcast %cst_19 : f32 to vector<48x256xf32>
    %26 = arith.addf %24, %25 : vector<48x256xf32>
    %c0_20 = arith.constant 0 : index
    %c0_21 = arith.constant 0 : index
    %27 = vector.load %arg8[%c0_20, %c0_21] : memref<4x48xf32, #tpu.memory_space<vmem>>, vector<4x48xf32>
    %cst_22 = arith.constant dense<0.000000e+00> : vector<4x256xf32>
    %28 = tpu.matmul %27, %26, %cst_22 {dimension_numbers = #tpu.dot_dimension_numbers<[1], [0], [0], [1], [0, 0, 1, 1], [], []>} : vector<4x48xf32>, vector<48x256xf32>, vector<4x256xf32> -> vector<4x256xf32>
    %c0_23 = arith.constant 0 : index
    %c0_24 = arith.constant 0 : index
    %29 = vector.load %arg9[%c0_23, %c0_24] : memref<52x256xf32, #tpu.memory_space<vmem>>, vector<48x256xf32>
    tpu.vector_store %arg9[%c0_23, %c0_24], %26 {strides = array<i32>} : memref<52x256xf32, #tpu.memory_space<vmem>>, vector<48x256xf32>,
    %c48 = arith.constant 48 : index
    %c0_25 = arith.constant 0 : index
    %30 = vector.load %arg9[%c48, %c0_25] : memref<52x256xf32, #tpu.memory_space<vmem>>, vector<4x256xf32>
    tpu.vector_store %arg9[%c48, %c0_25], %28 {strides = array<i32>} : memref<52x256xf32, #tpu.memory_space<vmem>>, vector<4x256xf32>,
    return
  }
  func.func @transform_0(%arg0: i32) -> (i32, i32) {
    %c0_i32 = arith.constant 0 : i32
    %c0_i32_0 = arith.constant 0 : i32
    return %c0_i32, %arg0 : i32, i32
  }
  func.func @transform_1(%arg0: i32) -> (i32, i32) {
    %c0_i32 = arith.constant 0 : i32
    %c0_i32_0 = arith.constant 0 : i32
    %c0_i32_1 = arith.constant 0 : i32
    return %c0_i32, %c0_i32_0 : i32, i32
  }
  func.func @transform_2(%arg0: i32) -> (i32, i32) {
    %c0_i32 = arith.constant 0 : i32
    %c0_i32_0 = arith.constant 0 : i32
    %c0_i32_1 = arith.constant 0 : i32
    return %c0_i32, %c0_i32_0 : i32, i32
  }
  func.func @transform_3(%arg0: i32) -> (i32, i32) {
    %c0_i32 = arith.constant 0 : i32
    %c0_i32_0 = arith.constant 0 : i32
    %c0_i32_1 = arith.constant 0 : i32
    return %c0_i32, %c0_i32_0 : i32, i32
  }
  func.func @transform_4(%arg0: i32) -> (i32, i32) {
    %c0_i32 = arith.constant 0 : i32
    %c0_i32_0 = arith.constant 0 : i32
    %c0_i32_1 = arith.constant 0 : i32
    return %c0_i32, %c0_i32_0 : i32, i32
  }
  func.func @transform_5(%arg0: i32) -> (i32, i32) {
    %c0_i32 = arith.constant 0 : i32
    %c0_i32_0 = arith.constant 0 : i32
    %c0_i32_1 = arith.constant 0 : i32
    return %c0_i32, %c0_i32_0 : i32, i32
  }
  func.func @transform_6(%arg0: i32) -> (i32, i32) {
    %c0_i32 = arith.constant 0 : i32
    %c0_i32_0 = arith.constant 0 : i32
    %c0_i32_1 = arith.constant 0 : i32
    return %c0_i32, %c0_i32_0 : i32, i32
  }
  func.func @transform_7(%arg0: i32) -> (i32, i32) {
    %c0_i32 = arith.constant 0 : i32
    %c0_i32_0 = arith.constant 0 : i32
    %c0_i32_1 = arith.constant 0 : i32
    return %c0_i32, %c0_i32_0 : i32, i32
  }
  func.func @transform_8(%arg0: i32) -> (i32, i32) {
    %c0_i32 = arith.constant 0 : i32
    %c0_i32_0 = arith.constant 0 : i32
    return %c0_i32, %arg0 : i32, i32
  }
}

</mosaic_0001>

<bundles_post_ra>
// kernel: skin_props_to_reflectance.1
= control target key start
LH: loop header
LB: loop body
LE: loop exit
PB: predicated region body
PF: predicated region fallthrough
CT: control target
= control target key end

     0   :  { %vm73_vm0 = vcmask 1043456   ;;  %v664_v1 = vmov 0.0   ;;  %v665_v3 = vmov 0   ;;  %vm60_vm1 = vcmask 31744   ;;  %s880_s0 = inlined_call_operand.vmem [shape: f32[4,256], index: 0, kind: input, shape index: {}]   ;;  %s881_s1 = inlined_call_operand.vmem [shape: f32[32,4], index: 1, kind: input, shape index: {}]   ;;  %s882_s2 = inlined_call_operand.vmem [shape: f32[32,1], index: 2, kind: input, shape index: {}]   ;;  %s883_s4 = inlined_call_operand.vmem [shape: f32[32,1], index: 4, kind: input, shape index: {}]   ;;  %s884_s6 = inlined_call_operand.vmem [shape: f32[48,1], index: 6, kind: input, shape index: {}]   ;;  %s885_s3 = inlined_call_operand.vmem [shape: f32[32,32], index: 3, kind: input, shape index: {}]   ;;  %s886_s5 = inlined_call_operand.vmem [shape: f32[48,32], index: 5, kind: input, shape index: {}]   ;;  %s887_s8 = inlined_call_operand.vmem [shape: f32[52,256], index: 8, kind: output, shape index: {}]   ;;  %s888_s7 = inlined_call_operand.vmem [shape: f32[4,48], index: 7, kind: input, shape index: {}]  }
   0x1   :  { %v29_v0 = vld [vmem:[%s880_s0] sm:$0xff]  ;;  %154 = vmatprep.mubr.f32.mxu1 %v664_v1  ;;  %142 = vmatprep.mubr.f32.mxu0 %v664_v1  ;;  %v37_v4 = vld [vmem:[%s882_s2 + $0x18] sm:$0xff]  ;;  %v32_v5 = vld [vmem:[%s881_s1 + $0x10] sm:$0xff]  ;;  %vm203_vm2 = vcmask 261120   ;;  %vm523_vm3 = vcmask 392192  }
   0x2   :  { %v59_v2 = vcombine.high %v29_v0, %v29_v0  ;;  %637 = vset.pattern.permute.xlu0 %v665_v3  ;;  %638 = vset.pattern.permute.xlu1 %v665_v3  ;;  %v30_v6 = vld [vmem:[%s881_s1] sm:$0xff]  ;;  %v36_v7 = vld [vmem:[%s882_s2 + $0x10] sm:$0xff]  ;;  %v35_v8 = vld [vmem:[%s882_s2 + $0x8] sm:$0xff] }
   0x3   :  { %55 = vperm.xlu0 %637, %v37_v4   ;;  %v33_v9 = vld [vmem:[%s881_s1 + $0x18] sm:$0xff]  ;;  %v31_v10 = vld [vmem:[%s881_s1 + $0x8] sm:$0xff]  ;;  %45 = vperm.xlu1 %638, %v35_v8   ;;  %v34_v12 = vld [vmem:[%s882_s2] sm:$0xff] }
   0x4   :  { %633 = vmatprep.subr.msk.mxu1 %vm73_vm0, %v59_v2  ;;  %616 = vmatprep.subr.msk.mxu0 %vm73_vm0, %v59_v2  ;;  %v182_v11 = vld [vmem:[%s883_s4 + $0x18] sm:$0xff]  ;;  %v180_v13 = vld [vmem:[%s883_s4 + $0x8] sm:$0xff]  ;;  %v181_v14 = vld [vmem:[%s883_s4 + $0x10] sm:$0xff] }
   0x5   :  { %634 = vmatpush1.msk.msra.mxu1 %vm73_vm0, %v29_v0  ;;  %617 = vmatpush1.msk.msra.mxu0 %vm73_vm0, %v29_v0  ;;  %v324_v15 = vld [vmem:[%s884_s6 + $0x28] sm:$0xff]  ;;  %v179_v16 = vld [vmem:[%s883_s4] sm:$0xff]  ;;  %v322_v17 = vld [vmem:[%s884_s6 + $0x18] sm:$0xff] }
   0x6   :  { %620 = vmatmul.mubr.msk.f32.vlgmr.msra.gmra.mxu1 %vm60_vm1, %v32_v5  ;;  %618 = vmatmul.mubr.msk.f32.vlgmr.msra.gmra.mxu0 %vm60_vm1, %v30_v6  ;;  %v323_v18 = vld [vmem:[%s884_s6 + $0x20] sm:$0xff]  ;;  %v320_v19 = vld [vmem:[%s884_s6 + $0x8] sm:$0xff]  ;;  %v321_v20 = vld [vmem:[%s884_s6 + $0x10] sm:$0xff] }
   0x7   :  { %160 = vmatprep.mubr.f32.mxu1 %v664_v1  ;;  %148 = vmatprep.mubr.f32.mxu0 %v664_v1  ;;  %v319_v21 = vld [vmem:[%s884_s6] sm:$0xff]  ;;  %v176_v51 = vld [vmem:[%s885_s3 + $0x8] sm:$0xff]  ;;  %v177_v52 = vld [vmem:[%s885_s3 + $0x10] sm:$0xff] }
   0x8   :  { %50 = vperm.xlu0 %637, %v36_v7   ;;  %40 = vperm.xlu1 %638, %v34_v12   ;;  %v175_v50 = vld [vmem:[%s885_s3] sm:$0xff]  ;;  %v178_v53 = vld [vmem:[%s885_s3 + $0x18] sm:$0xff] }
   0xa   :  { %621 = vmatmul.mubr.msk.f32.gmra.mxu1 %vm60_vm1, %v33_v9  ;;  %619 = vmatmul.mubr.msk.f32.gmra.mxu0 %vm60_vm1, %v31_v10 }
   0xb   :  { %280 = vmatprep.mubr.f32.mxu1 %v664_v1  ;;  %437 = vmatprep.mubr.f32.mxu0 %v664_v1 }
   0xc   :  { %200 = vperm.xlu0 %637, %v182_v11   ;;  %195 = vperm.xlu1 %638, %v181_v14  }
  0x10   :  { %190 = vperm.xlu0 %637, %v180_v13   ;;  %185 = vperm.xlu1 %638, %v179_v16  }
  0x14   :  { %352 = vperm.xlu0 %637, %v324_v15   ;;  %347 = vperm.xlu1 %638, %v323_v18  }
  0x18   :  { %342 = vperm.xlu0 %637, %v322_v17   ;;  %337 = vperm.xlu1 %638, %v321_v20   ;;  %v314_v20 = vld [vmem:[%s886_s5 + $0x8] sm:$0xff] }
  0x1c   :  { %332 = vperm.xlu0 %637, %v320_v19   ;;  %327 = vperm.xlu1 %638, %v319_v21   ;;  %v313_v19 = vld [vmem:[%s886_s5] sm:$0xff]  ;;  %v315_v21 = vld [vmem:[%s886_s5 + $0x10] sm:$0xff] }
  0x7e   :  { %v56_v22 = vpop.permute.xlu0 %55  ;;  %v46_v27 = vpop.permute.xlu1 %45 }
  0x83   :  { %v51_v30 = vpop.permute.xlu0 %50  ;;  %v41_v39 = vpop.permute.xlu1 %40 }
  0x87   :  { %v201_v59 = vpop.permute.xlu0 %200  ;;  %v196_v61 = vpop.permute.xlu1 %195 }
  0x8b   :  { %v191_v4 = vpop.permute.xlu0 %190  ;;  %v186_v8 = vpop.permute.xlu1 %185 }
  0xc6   :  { %v156_v23 = vpop.f32.mrf.mxu1  ;;  %v144_v24 = vpop.f32.mrf.mxu0 }
  0xc7   :  { %v157_v36 = vadd.f32 %v156_v23, %v51_v30  ;;  %v145_v45 = vadd.f32 %v144_v24, %v41_v39  ;;  %v317_v23 = vld [vmem:[%s886_s5 + $0x20] sm:$0xff]  ;;  %v318_v24 = vld [vmem:[%s886_s5 + $0x28] sm:$0xff] }
  0xc8   :  { %v158_v25 = vpop.f32.mrf.mxu1  ;;  %v146_v26 = vpop.f32.mrf.mxu0 }
  0xc9   :  { %v159_v34 = vadd.f32 %v158_v25, %v51_v30  ;;  %v147_v43 = vadd.f32 %v146_v26, %v41_v39  ;;  %v171_v44 = vmax.f32 %v157_v36, 0.0  ;;  %v167_v49 = vmax.f32 %v145_v45, 0.0  ;;  %v348_v25 = vpop.permute.xlu1 %347  ;;  %v353_v26 = vpop.permute.xlu0 %352 }
  0xca   :  { %v162_v28 = vpop.f32.mrf.mxu1  ;;  %v150_v29 = vpop.f32.mrf.mxu0 }
  0xcb   :  { %v163_v31 = vadd.f32 %v162_v28, %v56_v22  ;;  %v151_v41 = vadd.f32 %v150_v29, %v46_v27  ;;  %v172_v42 = vmax.f32 %v159_v34, 0.0  ;;  %v168_v48 = vmax.f32 %v147_v43, 0.0 }
  0xcc   :  { %v164_v32 = vpop.f32.mrf.mxu1  ;;  %v152_v33 = vpop.f32.mrf.mxu0 }
  0xcd   :  { %v165_v35 = vadd.f32 %v164_v32, %v56_v22  ;;  %v153_v38 = vadd.f32 %v152_v33, %v46_v27  ;;  %v173_v40 = vmax.f32 %v163_v31, 0.0  ;;  %v169_v47 = vmax.f32 %v151_v41, 0.0  ;;  %v316_v22 = vld [vmem:[%s886_s5 + $0x18] sm:$0xff]  ;;  %v338_v27 = vpop.permute.xlu1 %337  ;;  %v343_v28 = vpop.permute.xlu0 %342 }
  0xcf   :  { %v174_v37 = vmax.f32 %v165_v35, 0.0  ;;  %v170_v46 = vmax.f32 %v153_v38, 0.0 }
  0xd1   :  { %240 = vmatprep.subr.mxu1 %v174_v37  ;;  %v328_v29 = vpop.permute.xlu1 %327  ;;  %v333_v35 = vpop.permute.xlu0 %332 }
  0xd2   :  { %241 = vmatpush1.msra.mxu1 %v173_v40 }
  0xd3   :  { %242 = vmatprep.subr.mxu1 %v172_v42 }
  0xd4   :  { %243 = vmatpush1.msra.mxu1 %v171_v44 }
  0xd5   :  { %244 = vmatprep.subr.mxu1 %v170_v46 }
  0xd6   :  { %245 = vmatpush1.msra.mxu1 %v169_v47 }
  0xd7   :  { %246 = vmatprep.subr.mxu1 %v168_v48 }
  0xd8   :  { %247 = vmatpush1.msra.mxu1 %v167_v49 }
  0xd9   :  { %622 = vmatmul.mubr.msk.f32.vlgmr.msra.gmra.mxu1 %vm203_vm2, %v175_v50 }
  0xda   :  { %286 = vmatprep.mubr.f32.mxu1 %v664_v1 }
  0xdd   :  { %623 = vmatmul.mubr.msk.f32.gmra.mxu1 %vm203_vm2, %v176_v51 }
  0xde   :  { %292 = vmatprep.mubr.f32.mxu1 %v664_v1 }
  0xe1   :  { %624 = vmatmul.mubr.msk.f32.gmra.mxu1 %vm203_vm2, %v177_v52 }
  0xe2   :  { %298 = vmatprep.mubr.f32.mxu1 %v664_v1 }
  0xe5   :  { %625 = vmatmul.mubr.msk.f32.gmra.mxu1 %vm203_vm2, %v178_v53 }
  0xe6   :  { %591 = vmatprep.mubr.f32.mxu1 %v664_v1 }
 0x199   :  { %v282_v54 = vpop.f32.mrf.mxu1 }
 0x19a   :  { %v283_v13 = vadd.f32 %v282_v54, %v186_v8 }
 0x19b   :  { %v284_v55 = vpop.f32.mrf.mxu1 }
 0x19c   :  { %v285_v11 = vadd.f32 %v284_v55, %v186_v8  ;;  %v305_v18 = vmax.f32 %v283_v13, 0.0 }
 0x19d   :  { %v288_v56 = vpop.f32.mrf.mxu1 }
 0x19e   :  { %v289_v9 = vadd.f32 %v288_v56, %v191_v4  ;;  %v306_v17 = vmax.f32 %v285_v11, 0.0 }
 0x19f   :  { %v290_v57 = vpop.f32.mrf.mxu1 }
 0x1a0   :  { %v291_v6 = vadd.f32 %v290_v57, %v191_v4  ;;  %v307_v16 = vmax.f32 %v289_v9, 0.0 }
 0x1a1   :  { %v294_v58 = vpop.f32.mrf.mxu1 }
 0x1a2   :  { %v295_v5 = vadd.f32 %v294_v58, %v196_v61  ;;  %v308_v15 = vmax.f32 %v291_v6, 0.0 }
 0x1a3   :  { %v296_v60 = vpop.f32.mrf.mxu1 }
 0x1a4   :  { %v297_v2 = vadd.f32 %v296_v60, %v196_v61  ;;  %v309_v14 = vmax.f32 %v295_v5, 0.0 }
 0x1a5   :  { %v300_v62 = vpop.f32.mrf.mxu1 }
 0x1a6   :  { %v301_v63 = vadd.f32 %v300_v62, %v201_v59  ;;  %v310_v12 = vmax.f32 %v297_v2, 0.0 }
 0x1a7   :  { %v302_v0 = vpop.f32.mrf.mxu1 }
 0x1a8   :  { %v303_v3 = vadd.f32 %v302_v0, %v201_v59  ;;  %v311_v10 = vmax.f32 %v301_v63, 0.0 }
 0x1aa   :  { %v312_v7 = vmax.f32 %v303_v3, 0.0 }
 0x1ac   :  { %397 = vmatprep.subr.mxu0 %v312_v7 }
 0x1ad   :  { %398 = vmatpush1.msra.mxu0 %v311_v10 }
 0x1ae   :  { %399 = vmatprep.subr.mxu0 %v310_v12 }
 0x1af   :  { %400 = vmatpush1.msra.mxu0 %v309_v14 }
 0x1b0   :  { %401 = vmatprep.subr.mxu0 %v308_v15 }
 0x1b1   :  { %402 = vmatpush1.msra.mxu0 %v307_v16 }
 0x1b2   :  { %403 = vmatprep.subr.mxu0 %v306_v17 }
 0x1b3   :  { %404 = vmatpush1.msra.mxu0 %v305_v18 }
 0x1b4   :  { %626 = vmatmul.mubr.msk.f32.vlgmr.msra.gmra.mxu0 %vm203_vm2, %v313_v19 }
 0x1b5   :  { %443 = vmatprep.mubr.f32.mxu0 %v664_v1 }
 0x1b8   :  { %627 = vmatmul.mubr.msk.f32.gmra.mxu0 %vm203_vm2, %v314_v20 }
 0x1b9   :  { %449 = vmatprep.mubr.f32.mxu0 %v664_v1 }
 0x1bc   :  { %628 = vmatmul.mubr.msk.f32.gmra.mxu0 %vm203_vm2, %v315_v21 }
 0x1bd   :  { %455 = vmatprep.mubr.f32.mxu0 %v664_v1 }
 0x1c0   :  { %629 = vmatmul.mubr.msk.f32.gmra.mxu0 %vm203_vm2, %v316_v22 }
 0x1c1   :  { %461 = vmatprep.mubr.f32.mxu0 %v664_v1 }
 0x1c4   :  { %630 = vmatmul.mubr.msk.f32.gmra.mxu0 %vm203_vm2, %v317_v23 }
 0x1c5   :  { %467 = vmatprep.mubr.f32.mxu0 %v664_v1 }
 0x1c8   :  { %631 = vmatmul.mubr.msk.f32.gmra.mxu0 %vm203_vm2, %v318_v24 }
 0x274   :  { %v439_v30 = vpop.f32.mrf.mxu0 }
 0x275   :  { %v440_v31 = vadd.f32 %v439_v30, %v328_v29 }
 0x276   :  { %v441_v32 = vpop.f32.mrf.mxu0 }
 0x277   :  { %v474_v33 = vmul.f32 0.5, %v440_v31  ;;  %v442_v34 = vadd.f32 %v441_v32, %v328_v29 }
 0x278   :  { %v445_v36 = vpop.f32.mrf.mxu0 }
 0x279   :  { %640 = vtanh.f32 %v474_v33  ;;  %v475_v1 = vmul.f32 0.5, %v442_v34  ;;  %v446_v37 = vadd.f32 %v445_v36, %v333_v35 }
 0x27a   :  { %v447_v38 = vpop.f32.mrf.mxu0 }
 0x27b   :  { %642 = vtanh.f32 %v475_v1  ;;  %v476_v39 = vmul.f32 0.5, %v446_v37  ;;  %v448_v40 = vadd.f32 %v447_v38, %v333_v35  ;;  %v522_v38 = vld [vmem:[%s888_s7] sm:$0xf] }
 0x27c   :  { %v451_v41 = vpop.f32.mrf.mxu0 }
 0x27d   :  { %644 = vtanh.f32 %v476_v39  ;;  %v477_v42 = vmul.f32 0.5, %v448_v40  ;;  %v452_v43 = vadd.f32 %v451_v41, %v338_v27 }
 0x27e   :  { %v453_v44 = vpop.f32.mrf.mxu0 }
 0x27f   :  { %646 = vtanh.f32 %v477_v42  ;;  %v478_v45 = vmul.f32 0.5, %v452_v43  ;;  %v454_v46 = vadd.f32 %v453_v44, %v338_v27 }
 0x280   :  { %v457_v47 = vpop.f32.mrf.mxu0 }
 0x281   :  { %648 = vtanh.f32 %v478_v45  ;;  %v479_v48 = vmul.f32 0.5, %v454_v46  ;;  %v458_v49 = vadd.f32 %v457_v47, %v343_v28 }
 0x282   :  { %v459_v50 = vpop.f32.mrf.mxu0 }
 0x283   :  { %650 = vtanh.f32 %v479_v48  ;;  %v480_v51 = vmul.f32 0.5, %v458_v49  ;;  %v460_v52 = vadd.f32 %v459_v50, %v343_v28 }
 0x284   :  { %v463_v53 = vpop.f32.mrf.mxu0 }
 0x285   :  { %652 = vtanh.f32 %v480_v51  ;;  %v481_v54 = vmul.f32 0.5, %v460_v52  ;;  %v464_v55 = vadd.f32 %v463_v53, %v348_v25 }
 0x286   :  { %v641_v56 = vpop.eup %640  ;;  %v465_v57 = vpop.f32.mrf.mxu0 }
 0x287   :  { %v498_v58 = vmul.f32 0.5, %v641_v56  ;;  %654 = vtanh.f32 %v481_v54  ;;  %v482_v59 = vmul.f32 0.5, %v464_v55  ;;  %v466_v60 = vadd.f32 %v465_v57, %v348_v25 }
 0x288   :  { %v643_v61 = vpop.eup %642  ;;  %v469_v62 = vpop.f32.mrf.mxu0 }
 0x289   :  { %v831_v63 = vadd.f32 0.5, %v498_v58  ;;  %656 = vtanh.f32 %v482_v59  ;;  %v483_v0 = vmul.f32 0.5, %v466_v60  ;;  %v470_v2 = vadd.f32 %v469_v62, %v353_v26 }
 0x28a   :  { %v645_v3 = vpop.eup %644  ;;  %v471_v4 = vpop.f32.mrf.mxu0  ;;  %v499_v5 = vmul.f32 0.5, %v643_v61 }
 0x28b   :  { %598 = vst [vmem:[%s887_s8] sm:$0xff] %v831_v63  ;;  %v500_v6 = vmul.f32 0.5, %v645_v3  ;;  %658 = vtanh.f32 %v483_v0  ;;  %v484_v7 = vmul.f32 0.5, %v470_v2  ;;  %v472_v8 = vadd.f32 %v471_v4, %v353_v26 }
 0x28c   :  { %v647_v9 = vpop.eup %646  ;;  %v511_v10 = vadd.f32 0.5, %v499_v5 }
 0x28d   :  { %v512_v11 = vadd.f32 0.5, %v500_v6  ;;  %660 = vtanh.f32 %v484_v7  ;;  %v485_v12 = vmul.f32 0.5, %v472_v8  ;;  %v501_v13 = vmul.f32 0.5, %v647_v9 }
 0x28e   :  { %v649_v14 = vpop.eup %648  ;;  %599 = vst [vmem:[%s887_s8 + $0x8] sm:$0xff] %v511_v10 }
 0x28f   :  { %600 = vst [vmem:[%s887_s8 + $0x10] sm:$0xff] %v512_v11  ;;  %v502_v15 = vmul.f32 0.5, %v649_v14  ;;  %662 = vtanh.f32 %v485_v12  ;;  %v513_v16 = vadd.f32 0.5, %v501_v13 }
 0x290   :  { %v651_v17 = vpop.eup %650 }
 0x291   :  { %v514_v18 = vadd.f32 0.5, %v502_v15  ;;  %v503_v19 = vmul.f32 0.5, %v651_v17  ;;  %601 = vst [vmem:[%s887_s8 + $0x18] sm:$0xff] %v513_v16 }
 0x292   :  { %v653_v20 = vpop.eup %652 }
 0x293   :  { %602 = vst [vmem:[%s887_s8 + $0x20] sm:$0xff] %v514_v18  ;;  %v504_v21 = vmul.f32 0.5, %v653_v20  ;;  %v515_v22 = vadd.f32 0.5, %v503_v19 }
 0x294   :  { %v655_v23 = vpop.eup %654 }
 0x295   :  { %v516_v24 = vadd.f32 0.5, %v504_v21  ;;  %v505_v25 = vmul.f32 0.5, %v655_v23  ;;  %603 = vst [vmem:[%s887_s8 + $0x28] sm:$0xff] %v515_v22 }
 0x296   :  { %v657_v26 = vpop.eup %656 }
 0x297   :  { %604 = vst [vmem:[%s887_s8 + $0x30] sm:$0xff] %v516_v24  ;;  %v506_v27 = vmul.f32 0.5, %v657_v26  ;;  %v517_v28 = vadd.f32 0.5, %v505_v25 }
 0x298   :  { %v659_v29 = vpop.eup %658 }
 0x299   :  { %v518_v30 = vadd.f32 0.5, %v506_v27  ;;  %v507_v31 = vmul.f32 0.5, %v659_v29  ;;  %605 = vst [vmem:[%s887_s8 + $0x38] sm:$0xff] %v517_v28 }
 0x29a   :  { %v661_v32 = vpop.eup %660 }
 0x29b   :  { %606 = vst [vmem:[%s887_s8 + $0x40] sm:$0xff] %v518_v30  ;;  %v508_v33 = vmul.f32 0.5, %v661_v32  ;;  %v519_v34 = vadd.f32 0.5, %v507_v31 }
 0x29c   :  { %v663_v35 = vpop.eup %662 }
 0x29d   :  { %v520_v36 = vadd.f32 0.5, %v508_v33  ;;  %v509_v1 = vmul.f32 0.5, %v663_v35  ;;  %607 = vst [vmem:[%s887_s8 + $0x48] sm:$0xff] %v519_v34 }
 0x29f   :  { %608 = vst [vmem:[%s887_s8 + $0x50] sm:$0xff] %v520_v36  ;;  %v521_v37 = vadd.f32 0.5, %v509_v1 }
 0x2a1   :  { %547 = vmatprep.subr.mxu1 %v521_v37  ;;  %609 = vst [vmem:[%s887_s8 + $0x58] sm:$0xff] %v521_v37 }
 0x2a2   :  { %548 = vmatpush1.msra.mxu1 %v520_v36 }
 0x2a3   :  { %549 = vmatprep.subr.mxu1 %v519_v34 }
 0x2a4   :  { %550 = vmatpush1.msra.mxu1 %v518_v30 }
 0x2a5   :  { %551 = vmatprep.subr.mxu1 %v517_v28 }
 0x2a6   :  { %552 = vmatpush1.msra.mxu1 %v516_v24 }
 0x2a7   :  { %553 = vmatprep.subr.mxu1 %v515_v22 }
 0x2a8   :  { %554 = vmatpush1.msra.mxu1 %v514_v18 }
 0x2a9   :  { %555 = vmatprep.subr.mxu1 %v513_v16 }
 0x2aa   :  { %556 = vmatpush1.msra.mxu1 %v512_v11 }
 0x2ab   :  { %557 = vmatprep.subr.mxu1 %v511_v10 }
 0x2ac   :  { %558 = vmatpush1.msra.mxu1 %v831_v63 }
 0x2ad   :  { %632 = vmatmul.mubr.msk.f32.vlgmr.msra.gmra.mxu1 %vm523_vm3, %v522_v38 }
 0x36d   :  { %v593_v39 = vpop.f32.mrf.mxu1 }
 0x36e   :  { %610 = vst [vmem:[%s887_s8 + $0x60] sm:$0xf] %v593_v39 }
 0x36f   :  { %v595_v40 = vpop.f32.mrf.mxu1 }
 0x370   :  { %611 = vst [vmem:[%s887_s8 + $0x68] sm:$0xf] %v595_v40 }

</bundles_post_ra>
